<compile_context>
chip_gen: v5e
topology: v5e:2x2
jax: 0.10.0
libtpu: 0.0.40
codegen_flags: <defaults>
</compile_context>

<pallas_src>
import jax
import jax.numpy as jnp
from jax.experimental import pallas as pl
from jax.experimental.pallas import tpu as pltpu


def _round_up(x, m):
    return ((x + m - 1) // m) * m


def _sublane_multiple(dtype):
    itemsize = jnp.dtype(dtype).itemsize
    return {4: 8, 2: 16, 1: 32}.get(itemsize, 8)


def _pos_enc_kernel(x_ref, pe_ref, o_ref):
    # x_ref : (ts, tb, D)  input tile
    # pe_ref: (ts, 1,  D)  positional-embedding rows for this seq tile
    # o_ref : (ts, tb, D)  output tile
    # Sublane-broadcast add across the batch axis: no materialized
    # batch-replicated embedding, no lane shuffles.
    o_ref[...] = (x_ref[...] + pe_ref[...]).astype(o_ref.dtype)


def learned_positional_encoding(x, pe_table, *, out_dtype=None):
    """
    x        : [seq_len, batch, d_model]
    pe_table : [max_seq_len, d_model]   (the nn.Embedding weight)
    returns  : [seq_len, batch, d_model]
               dtype = result_type(x, pe_table) unless out_dtype is given.
    """
    seq_len, batch, d_model = x.shape
    max_seq_len, d_model_pe = pe_table.shape
    assert d_model_pe == d_model, "embedding dim mismatch"
    # PyTorch's embedding lookup would raise on out-of-range positions.
    assert seq_len <= max_seq_len, "seq_len exceeds max_seq_len of the embedding table"

    if out_dtype is None:
        out_dtype = jnp.result_type(x.dtype, pe_table.dtype)

    # ---- generation-aware VMEM budget for the double-buffered footprint ----
    try:
        vmem_cap = pltpu.get_tpu_info().vmem_capacity_bytes
    except Exception:
        vmem_cap = 64 * 1024 * 1024  # conservative (v7x per-TC VMEM)
    # Stay well under the 32 MiB scoped-VMEM default on every generation.
    budget = min(vmem_cap // 4, 24 * 1024 * 1024)

    d_pad = _round_up(d_model, 128)  # lane padding of the minor dim in VMEM

    def footprint_bytes(ts, tb):
        # x, out and pe blocks are all double-buffered by the pipeline.
        xb = ts * _round_up(tb, _sublane_multiple(x.dtype)) * d_pad * jnp.dtype(x.dtype).itemsize
        ob = ts * _round_up(tb, _sublane_multiple(out_dtype)) * d_pad * jnp.dtype(out_dtype).itemsize
        pb = ts * _sublane_multiple(pe_table.dtype) * d_pad * jnp.dtype(pe_table.dtype).itemsize
        return 2 * (xb + ob + pb)

    # Batch tile: full batch unless one seq row already busts the budget, in
    # which case tile batch in sublane-aligned chunks (second grid axis).
    tb = batch
    if footprint_bytes(1, tb) > budget:
        sm = max(_sublane_multiple(x.dtype), _sublane_multiple(out_dtype))
        tb = sm
        while 2 * tb < batch and footprint_bytes(1, 2 * tb) <= budget:
            tb *= 2
        tb = min(tb, batch)

    # Seq tile: biggest that fits the budget (ts has no layout constraint).
    ts = max(1, budget // max(1, footprint_bytes(1, tb)))
    ts = min(ts, seq_len)

    grid_b = pl.cdiv(batch, tb)
    # Megacore (v7x): keep at least two grid blocks so the "parallel" grid can
    # be sharded across the two TensorCores; neutral on v5e/v6e.
    if grid_b == 1 and seq_len >= 2:
        ts = min(ts, pl.cdiv(seq_len, 2))
    grid_s = pl.cdiv(seq_len, ts)

    pe3 = pe_table.reshape(max_seq_len, 1, d_model)  # free, contiguous reshape

    out = pl.pallas_call(
        _pos_enc_kernel,
        out_shape=jax.ShapeDtypeStruct((seq_len, batch, d_model), out_dtype),
        grid=(grid_s, grid_b),
        in_specs=[
            pl.BlockSpec((ts, tb, d_model), lambda i, j: (i, j, 0)),   # x tiles
            pl.BlockSpec((ts, 1, d_model), lambda i, j: (i, 0, 0)),    # pe rows
        ],
        out_specs=pl.BlockSpec((ts, tb, d_model), lambda i, j: (i, j, 0)),
        compiler_params=pltpu.CompilerParams(
            dimension_semantics=("parallel", "parallel"),
        ),
    )(x, pe3)

    return out


if __name__ == "__main__":
    # Small shapes consistent with the module: seq=8, batch=2, d_model=32.
    seq_len, batch, d_model = 8, 2, 32
    max_seq_len = 250

    key = jax.random.PRNGKey(0)
    kx, kw = jax.random.split(key)

    x = jax.random.normal(kx, (seq_len, batch, d_model), dtype=jnp.float32)
    # Deterministic stand-in for the nn.Embedding(max_seq_len, d_model) weight.
    pe_table = jax.random.normal(kw, (max_seq_len, d_model), dtype=jnp.float32)

    out = learned_positional_encoding(x, pe_table)
    out = jax.block_until_ready(out)

    # Reference check (plain JAX) of the exact PyTorch semantics.
    ref = x + pe_table[:seq_len][:, None, :]
    assert out.shape == (seq_len, batch, d_model)
    assert out.dtype == ref.dtype
    assert jnp.allclose(out, ref, atol=1e-6), "mismatch vs reference"

    print("KERNEL_OK")
</pallas_src>

<mosaic_0001>
module attributes {stable_mosaic.version = 11 : i64} {
  func.func @_pos_enc_kernel(%arg0: i32, %arg1: i32, %arg2: memref<4x2x32xf32, #tpu.memory_space<vmem>>, %arg3: memref<4x1x32xf32, #tpu.memory_space<vmem>>, %arg4: memref<4x2x32xf32, #tpu.memory_space<vmem>>) attributes {dimension_semantics = [#tpu.dimension_semantics<parallel>, #tpu.dimension_semantics<parallel>], iteration_bounds = array<i64: 2, 1>, scalar_prefetch = 0 : i64, scratch_operands = 0 : i64, tpu.core_type = #tpu.core_type<tc>, window_params = [{transform_indices = @transform_0, window_bounds = array<i64: 4, 2, 32>}, {transform_indices = @transform_1, window_bounds = array<i64: 4, 1, 32>}, {transform_indices = @transform_2, window_bounds = array<i64: 4, 2, 32>}]} {
    %c0 = arith.constant 0 : index
    %c0_0 = arith.constant 0 : index
    %c0_1 = arith.constant 0 : index
    %0 = vector.load %arg2[%c0, %c0_0, %c0_1] : memref<4x2x32xf32, #tpu.memory_space<vmem>>, vector<4x2x32xf32>
    %c0_2 = arith.constant 0 : index
    %c0_3 = arith.constant 0 : index
    %c0_4 = arith.constant 0 : index
    %1 = vector.load %arg3[%c0_2, %c0_3, %c0_4] : memref<4x1x32xf32, #tpu.memory_space<vmem>>, vector<4x1x32xf32>
    %2 = vector.broadcast %1 : vector<4x1x32xf32> to vector<4x2x32xf32>
    %3 = arith.addf %0, %2 : vector<4x2x32xf32>
    %c0_5 = arith.constant 0 : index
    %c0_6 = arith.constant 0 : index
    %c0_7 = arith.constant 0 : index
    %4 = vector.load %arg4[%c0_5, %c0_6, %c0_7] : memref<4x2x32xf32, #tpu.memory_space<vmem>>, vector<4x2x32xf32>
    tpu.vector_store %arg4[%c0_5, %c0_6, %c0_7], %3 {strides = array<i32>} : memref<4x2x32xf32, #tpu.memory_space<vmem>>, vector<4x2x32xf32>,
    return
  }
  func.func @transform_0(%arg0: i32, %arg1: i32) -> (i32, i32, i32) {
    %c0_i32 = arith.constant 0 : i32
    %c0_i32_0 = arith.constant 0 : i32
    return %arg0, %arg1, %c0_i32 : i32, i32, i32
  }
  func.func @transform_1(%arg0: i32, %arg1: i32) -> (i32, i32, i32) {
    %c0_i32 = arith.constant 0 : i32
    %c0_i32_0 = arith.constant 0 : i32
    %c0_i32_1 = arith.constant 0 : i32
    return %arg0, %c0_i32, %c0_i32_0 : i32, i32, i32
  }
  func.func @transform_2(%arg0: i32, %arg1: i32) -> (i32, i32, i32) {
    %c0_i32 = arith.constant 0 : i32
    %c0_i32_0 = arith.constant 0 : i32
    return %arg0, %arg1, %c0_i32 : i32, i32, i32
  }
}

</mosaic_0001>

<bundles_post_ra>
// kernel: tpu_custom_call.1
= control target key start
LH: loop header
LB: loop body
LE: loop exit
PB: predicated region body
PF: predicated region fallthrough
CT: control target
= control target key end

     0   :  { %7 = vsyncpa [#allocation3], 0  ;;  %s614_s0 = inlined_call_operand.vmem [shape: f32[8,2,32], index: 0, kind: input, shape index: {}]   ;;  %s615_s1 = inlined_call_operand.vmem [shape: f32[250,1,32], index: 1, kind: input, shape index: {}]   ;;  %s616_s2 = inlined_call_operand.hbm [shape: f32[8,2,32], index: 2, kind: output, shape index: {}]  }
   0x1   :  { %9 = vsyncpa [#allocation3 + $0x1], 0  ;;  %s507_s9 = smov 0   ;;  %s509_s10 = smov 0  }
   0x2   :  { %s511_s11 = smov 0   ;;  %s513_s12 = smov 0  }
   0x3   :  { %s515_s13 = smov 0   ;;  %s517_s14 = smov 0  }
   0x4 LB: > { %s334_s15 = sadd.s32 4294967295, %s488_s14   ;;  %s335_s16 = sadd.s32 4294967294, %s488_s14   ;;  %s488_s14 = sphi %s517_s14, %s15_s14   ;;  %s484_s13 = sphi %s515_s13, %s623_s13   ;;  %s480_s12 = sphi %s513_s12, %s622_s12   ;;  %s476_s11 = sphi %s511_s11, %s621_s11   ;;  %s472_s10 = sphi %s509_s10, %s620_s10   ;;  %s468_s9 = sphi %s507_s9, %s619_s9  }
   0x5   : > { %s27_s17 = sadd.s32 1, %s484_s13  ;;  %s90_s18 = sadd.s32 1, %s476_s11 }
   0x6   : > { %p29_p0 = scmp.ge.s32.totalorder %s27_s17, 2  ;;  %p100_p1 = scmp.ne.s32.totalorder %s476_s11, %s472_s10 }
   0x7   : > { %p101_p2 = scmp.eq.s32.totalorder %s334_s15, 1  ;;  %p106_p3 = scmp.ne.s32.totalorder %s472_s10, %s468_s9 }
   0x8   : > { %s625_s17 = smov (%p29_p0, %s27_s17), 0  ;;  %p107_p5 = scmp.eq.s32.totalorder %s335_s16, 1 }
   0x9   : > { %p547_p4 = por %p101_p2, %p100_p1  ;;  %s85_s20 = ssub.s32 %s484_s13, %s625_s17 }
   0xa   : > { %p338_p6 = scmp.ge.s32.totalorder %s488_s14, 1  ;;  %p88_p7 = scmp.eq.s32.totalorder %s85_s20, 0 }
   0xb   : > { %p554_p8 = por %p107_p5, %p106_p3  ;;  %p151_p9 = scmp.lt.s32.totalorder %s488_s14, 3 }
   0xc   : > { %s560_s22 = scalar_select %p88_p7, %s476_s11, %s90_s18  }
   0xd   : > { %p152_p10 = pnand %p338_p6, %p151_p9 }
   0xe   : > { %s180_s23 = sand.u32 (!%p152_p10), 1, %s472_s10   ;;  %s340_s24 = sshll.u32 (!%p152_p10), %s480_s12, 2 }
   0xf   : > { %155 = sbr.rel (%p152_p10) target bundleno = 38 (0x26), region = 28  ;;  %p184_p11 = scmp.lt.s32.totalorder (!%p152_p10), %s340_s24, 7 }
  0x10   : > { %s339_s25 = sshll.u32 (!%p152_p10), %s180_s23, 3  ;;  %p196_p12 = scmp.lt.s32.totalorder (!%p152_p10), %s340_s24, 249 }
  0x11   : > { %s182_s6 = scalar_lea.vmem (!%p152_p10), [#allocation2], %s339_s25  ;;  %s348_s8 = sshll.u32 (!%p152_p10), %s480_s12, 3 }
  0x12   : > { %s247_s7 = sshll.u32 (!%p152_p10), %s182_s6, 4  ;;  %s246_s18 = scalar_lea.hbm (!%p152_p10), %s616_s2, %s348_s8  ;;  %s248_s7 = int_to_ptr.vmem [resolvable:$true] %s247_s7 }
  0x13   : > { %s249_s20 = sshll.u32 (!%p152_p10), %s246_s18, 4  ;;  %s234_s12 = scalar_lea.sflag (!%p152_p10), [#allocation3], %s180_s23  ;;  %s250_s20 = int_to_ptr.hbm [resolvable:$true] %s249_s20 }
  0x14   : > { %s185_s26 = scalar_select %p184_p11, %s340_s24, 7  ;;  %vm228_vm0 = vcmask 254976  }
  0x15   : > { %s627_s24 = smov (!%p196_p12, %s340_s24), 249  ;;  %s430_s28 = scalar_lea.hbm %s616_s2, 16 }
  0x16   : > { %s341_s27 = sshll.u32 %s185_s26, 1  ;;  %s198_s5 = scalar_lea.vmem %s615_s1, %s627_s24 }
  0x17   : > { %s190_s30 = scalar_lea.vmem %s614_s0, %s341_s27  ;;  %v406_v1 = vld [vmem:[%s198_s5] ss:$0 sm:$0xff]  ;;  %v407_v4 = vld [vmem:[%s198_s5 + $0x1] ss:$0 sm:$0xff]  ;;  %v408_v6 = vld [vmem:[%s198_s5 + $0x2] ss:$0 sm:$0xff] }
  0x18   : > { %v204_v0 = vld [vmem:[%s190_s30] sm:$0x3]  ;;  %v205_v2 = vld [vmem:[%s190_s30 + $0x2] sm:$0x3]  ;;  %v206_v5 = vld [vmem:[%s190_s30 + $0x4] sm:$0x3] }
  0x19   : > { %v224_v3 = vadd.f32 %v406_v1, %v204_v0  ;;  %v207_v7 = vld [vmem:[%s190_s30 + $0x6] sm:$0x3]  ;;  %v225_v8 = vadd.f32 %v407_v4, %v205_v2  ;;  %v409_v9 = vld [vmem:[%s198_s5 + $0x3] ss:$0 sm:$0xff]  ;;  %v226_v10 = vadd.f32 %v408_v6, %v206_v5  ;;  %s424_s24 = sshra.s32 %s250_s20, 4  ;;  %s425_s24 = int_to_ptr.hbm [resolvable:$true] %s424_s24 }
  0x1a   : > { %v227_v11 = vadd.f32 %v409_v9, %v207_v7  ;;  %s426_s25 = scalar_lea.hbm %s425_s24, 8  ;;  %p431_p2 = scmp.lt.s32.totalorder %s425_s24, %s616_s2 }
  0x1b   : > { %229 = vst.msk [vmem:[%s182_s6] sm:$0x3] %vm228_vm0, %v224_v3  ;;  %p427_p13 = scmp.ne.s32.totalorder %s425_s24, %s426_s25  ;;  %p432_p3 = scmp.lt.s32.totalorder %s430_s28, %s426_s25 }
  0x1c   : > { %230 = vst.msk [vmem:[%s182_s6 + $0x2] sm:$0x3] %vm228_vm0, %v225_v8 }
  0x1d   : > { %231 = vst.msk [vmem:[%s182_s6 + $0x4] sm:$0x3] %vm228_vm0, %v226_v10  ;;  %p428_p0 = pnand %p427_p13, %p547_p4  ;;  %p433_p5 = por %p432_p3, %p431_p2 }
  0x1e   : > { %232 = vst.msk [vmem:[%s182_s6 + $0x6] sm:$0x3] %vm228_vm0, %v227_v11 }
  0x1f   : > { %p429_p1 = pneg %p428_p0 }
  0x21   : > { %p434_p6 = pnand %p433_p5, %p429_p1 }
  0x23   : > { %437 = shalt.err (!%p434_p6)
}
  0x24   : > { %s490_s23 = smov 32   ;;  %s491_s3 = smov 2  }
  0x25   : > { %349 = dma.vmem_to_hbm [thread:$0]  (%p547_p4), %s248_s7, 128, %s250_s20, %s234_s12, %s490_s23, %s490_s23, %s491_s3  }
  0x26 PF: > { %p355_p7 = scmp.ge.s32.totalorder %s488_s14, 2  ;;  %s264_s4 = sand.u32 1, %s468_s9  }
  0x27   : > { %s265_s5 = scalar_lea.sflag [#allocation3], %s264_s4 }
  0x28   : > { %p352_p9 = pnand %p355_p7, %p554_p8 }
  0x2a   : > { %p353_p10 = pneg %p352_p9 }
  0x2c   : > { %463 = dma.done.wait (%p353_p10), %s265_s5, 128  }
  0x2d   : > { %465 = vsyncadd (%p353_p10), %s265_s5, 4294967168  ;;  %s15_s14 = sadd.s32 1, %s488_s14   ;;  %s619_s9 = smov %s472_s10 }
  0x2e   : > { %p12_p11 = scmp.ge.s32.totalorder %s15_s14, 4   ;;  %s620_s10 = smov %s476_s11 }
  0x2f   : > { %s621_s11 = smov %s560_s22  ;;  %s622_s12 = smov %s484_s13 }
  0x30   : > { %s623_s13 = smov %s625_s17  ;;  %14 = sbr.rel (!%p12_p11) target bundleno = 4 (0x4), region = 66 }
  0x35   :  { %271 = vsyncpa [#allocation3], 1 }
  0x36   :  { %273 = vsyncpa [#allocation3 + $0x1], 1 }

</bundles_post_ra>
